<compile_context>
chip_gen: v5e
topology: v5e:2x2
jax: 0.10.0
libtpu: 0.0.40
codegen_flags: <defaults>
</compile_context>

<pallas_src>
import functools

import jax
import jax.numpy as jnp
from jax.experimental import pallas as pl
from jax.experimental.pallas import tpu as pltpu

LN_EPS = 1e-5


def _round_up(v, m):
    return (v + m - 1) // m * m


def mlp_kernel(x_ref, g_ref, b_ref,
               w1_ref, b1_ref, w2_ref, b2_ref, w3_ref, b3_ref,
               o_ref, *, mm_dtype):
    # ---- LayerNorm over the feature (lane) axis, in f32 ----
    x = x_ref[...].astype(jnp.float32)                        # (tm, D)
    mean = jnp.mean(x, axis=-1, keepdims=True)
    var = jnp.mean((x - mean) ** 2, axis=-1, keepdims=True)
    xn = (x - mean) * jax.lax.rsqrt(var + LN_EPS)
    xn = xn * g_ref[...] + b_ref[...]                         # affine (1, D)

    # ---- Linear(D, Hp) + ReLU  (bf16 operands, f32 accumulation) ----
    h1 = jnp.dot(xn.astype(mm_dtype), w1_ref[...],
                 preferred_element_type=jnp.float32) + b1_ref[...]
    h1 = jnp.maximum(h1, 0.0)

    # ---- Linear(Hp, D) + ReLU ----
    h2 = jnp.dot(h1.astype(mm_dtype), w2_ref[...],
                 preferred_element_type=jnp.float32) + b2_ref[...]
    h2 = jnp.maximum(h2, 0.0)

    # ---- Linear(D, Op) ----
    out = jnp.dot(h2.astype(mm_dtype), w3_ref[...],
                  preferred_element_type=jnp.float32) + b3_ref[...]

    o_ref[...] = out.astype(o_ref.dtype)


def mlp_pallas(x, params, *, tm=256, use_bf16=True):
    """x: [N, in_features] rows. Returns [N, out_features]."""
    g, b, w1, b1, w2, b2, w3, b3 = params
    N, D = x.shape
    H = w1.shape[1]          # 2*D
    O = w3.shape[1]

    # ---- lane-dense padding of the hidden and output feature axes ----
    Hp = _round_up(H, 128)
    Op = _round_up(O, 128)
    w1p = jnp.pad(w1, ((0, 0), (0, Hp - H)))
    b1p = jnp.pad(b1, ((0, 0), (0, Hp - H)))
    w2p = jnp.pad(w2, ((0, Hp - H), (0, 0)))
    w3p = jnp.pad(w3, ((0, 0), (0, Op - O)))
    b3p = jnp.pad(b3, ((0, 0), (0, Op - O)))

    mm_dtype = jnp.bfloat16 if use_bf16 else jnp.float32
    # cast weights once, outside the hot path
    w1p = w1p.astype(mm_dtype)
    w2p = w2p.astype(mm_dtype)
    w3p = w3p.astype(mm_dtype)

    # ---- row tiling: single grid step for tiny N, else tm-row tiles ----
    tm_eff = min(tm, _round_up(N, 8))
    Np = _round_up(N, tm_eff)
    xp = jnp.pad(x, ((0, Np - N), (0, 0)))   # zero rows -> finite values, sliced off
    grid = (Np // tm_eff,)

    # ---- explicit VMEM budget (v7x only has 64 MiB physical) ----
    wbytes = jnp.dtype(mm_dtype).itemsize
    weights_b = (D * Hp + Hp * D + D * Op) * wbytes + (2 * D + Hp + D + Op) * 4
    io_b = tm_eff * (D + Op) * x.dtype.itemsize
    inter_b = tm_eff * (D + Hp + D + Op) * 4
    est = 2 * (weights_b + io_b) + inter_b   # double-buffered in/out + live f32 intermediates
    vmem_limit = int(min(max(4 * est, 32 << 20), 48 << 20))

    full = lambda shape: pl.BlockSpec(shape, lambda i: tuple(0 for _ in shape))

    out_p = pl.pallas_call(
        functools.partial(mlp_kernel, mm_dtype=mm_dtype),
        out_shape=jax.ShapeDtypeStruct((Np, Op), x.dtype),
        grid_spec=pltpu.PrefetchScalarGridSpec(
            num_scalar_prefetch=0,
            grid=grid,
            in_specs=[
                pl.BlockSpec((tm_eff, D), lambda i: (i, 0)),  # x rows
                full((1, D)),                                 # ln gamma
                full((1, D)),                                 # ln beta
                full((D, Hp)),                                # w1 (padded cols)
                full((1, Hp)),                                # b1
                full((Hp, D)),                                # w2 (padded rows)
                full((1, D)),                                 # b2
                full((D, Op)),                                # w3 (padded cols)
                full((1, Op)),                                # b3
            ],
            out_specs=pl.BlockSpec((tm_eff, Op), lambda i: (i, 0)),
        ),
        compiler_params=pltpu.CompilerParams(
            dimension_semantics=("parallel",),
            vmem_limit_bytes=vmem_limit),
    )(xp, g, b, w1p, b1p, w2p, b2, w3p, b3p)

    return out_p[:N, :O]


def mlp_reference(x, params):
    g, b, w1, b1, w2, b2, w3, b3 = params
    x = x.astype(jnp.float32)
    mean = jnp.mean(x, axis=-1, keepdims=True)
    var = jnp.mean((x - mean) ** 2, axis=-1, keepdims=True)
    xn = (x - mean) * jax.lax.rsqrt(var + LN_EPS) * g + b
    h1 = jnp.maximum(xn @ w1 + b1, 0.0)
    h2 = jnp.maximum(h1 @ w2 + b2, 0.0)
    return h2 @ w3 + b3


def init_params(key, in_features, out_features):
    """Deterministic synthetic params. Linear weights stored as (in, out),
    i.e. already transposed relative to torch's (out, in)."""
    D, O, H = in_features, out_features, in_features * 2
    k1, k2, k3 = jax.random.split(key, 3)
    scale = lambda fan_in: 1.0 / jnp.sqrt(jnp.float32(fan_in))
    g = jnp.ones((1, D), jnp.float32)          # nn.LayerNorm default weight
    b = jnp.zeros((1, D), jnp.float32)         # nn.LayerNorm default bias
    w1 = jax.random.uniform(k1, (D, H), jnp.float32, -1, 1) * scale(D)
    b1 = jnp.zeros((1, H), jnp.float32)
    w2 = jax.random.uniform(k2, (H, D), jnp.float32, -1, 1) * scale(H)
    b2 = jnp.zeros((1, D), jnp.float32)
    w3 = jax.random.uniform(k3, (D, O), jnp.float32, -1, 1) * scale(D)
    b3 = jnp.zeros((1, O), jnp.float32)
    return (g, b, w1, b1, w2, b2, w3, b3)


def _check(out, ref, tol):
    assert jnp.all(jnp.isfinite(out)), "non-finite output"
    assert jnp.allclose(out, ref, atol=tol, rtol=tol), "mismatch vs reference"


if __name__ == "__main__":
    key = jax.random.PRNGKey(0)

    # ---- small demo at module-like shapes: batch=2, seq=8, hidden=32 ----
    batch, seq, in_features, out_features = 2, 8, 32, 16
    kx, kp, key = jax.random.split(key, 3)
    x = jax.random.normal(kx, (batch, seq, in_features), jnp.float32)
    params = init_params(kp, in_features, out_features)

    x_rows = x.reshape(batch * seq, in_features)
    out_rows = mlp_pallas(x_rows, params)                    # grid collapses to 1 step
    out = out_rows.reshape(batch, seq, out_features)
    jax.block_until_ready(out)
    ref = mlp_reference(x_rows, params).reshape(batch, seq, out_features)
    _check(out, ref, 5e-2)                                   # bf16-operand tolerance

    # ---- medium run: exercises the 256-row tiling and lane-dense features ----
    b2_, s2_, d2_, o2_ = 4, 128, 128, 128
    kx2, kp2, key = jax.random.split(key, 3)
    x2 = jax.random.normal(kx2, (b2_, s2_, d2_), jnp.float32)
    params2 = init_params(kp2, d2_, o2_)
    x2_rows = x2.reshape(b2_ * s2_, d2_)
    out2 = mlp_pallas(x2_rows, params2, tm=256)              # grid=(2,), parallel
    jax.block_until_ready(out2)
    ref2 = mlp_reference(x2_rows, params2)
    _check(out2, ref2, 5e-2)

    print("KERNEL_OK")
</pallas_src>

<mosaic_0001>
module attributes {stable_mosaic.version = 11 : i64} {
  func.func @mlp_kernel(%arg0: i32, %arg1: memref<16x32xf32, #tpu.memory_space<vmem>>, %arg2: memref<1x32xf32, #tpu.memory_space<vmem>>, %arg3: memref<1x32xf32, #tpu.memory_space<vmem>>, %arg4: memref<32x128xbf16, #tpu.memory_space<vmem>>, %arg5: memref<1x128xf32, #tpu.memory_space<vmem>>, %arg6: memref<128x32xbf16, #tpu.memory_space<vmem>>, %arg7: memref<1x32xf32, #tpu.memory_space<vmem>>, %arg8: memref<32x128xbf16, #tpu.memory_space<vmem>>, %arg9: memref<1x128xf32, #tpu.memory_space<vmem>>, %arg10: memref<16x128xf32, #tpu.memory_space<vmem>>) attributes {dimension_semantics = [#tpu.dimension_semantics<parallel>], iteration_bounds = array<i64: 1>, scalar_prefetch = 0 : i64, scratch_operands = 0 : i64, tpu.core_type = #tpu.core_type<tc>, window_params = [{transform_indices = @transform_0, window_bounds = array<i64: 16, 32>}, {pipeline_mode = #tpu.pipeline_mode<synchronous>, transform_indices = @transform_1, window_bounds = array<i64: 1, 32>}, {pipeline_mode = #tpu.pipeline_mode<synchronous>, transform_indices = @transform_2, window_bounds = array<i64: 1, 32>}, {pipeline_mode = #tpu.pipeline_mode<synchronous>, transform_indices = @transform_3, window_bounds = array<i64: 32, 128>}, {pipeline_mode = #tpu.pipeline_mode<synchronous>, transform_indices = @transform_4, window_bounds = array<i64: 1, 128>}, {pipeline_mode = #tpu.pipeline_mode<synchronous>, transform_indices = @transform_5, window_bounds = array<i64: 128, 32>}, {pipeline_mode = #tpu.pipeline_mode<synchronous>, transform_indices = @transform_6, window_bounds = array<i64: 1, 32>}, {pipeline_mode = #tpu.pipeline_mode<synchronous>, transform_indices = @transform_7, window_bounds = array<i64: 32, 128>}, {pipeline_mode = #tpu.pipeline_mode<synchronous>, transform_indices = @transform_8, window_bounds = array<i64: 1, 128>}, {transform_indices = @transform_9, window_bounds = array<i64: 16, 128>}]} {
    %c0 = arith.constant 0 : index
    %c0_0 = arith.constant 0 : index
    %0 = vector.load %arg1[%c0, %c0_0] : memref<16x32xf32, #tpu.memory_space<vmem>>, vector<16x32xf32>
    %cst = arith.constant dense<0.000000e+00> : vector<16xf32>
    %1 = vector.multi_reduction <add>, %0, %cst [1] : vector<16x32xf32> to vector<16xf32>
    %2 = vector.shape_cast %1 : vector<16xf32> to vector<16x1xf32>
    %cst_1 = arith.constant 3.200000e+01 : f32
    %3 = vector.broadcast %cst_1 : f32 to vector<16x1xf32>
    %4 = arith.divf %2, %3 : vector<16x1xf32>
    %5 = vector.broadcast %4 : vector<16x1xf32> to vector<16x32xf32>
    %6 = arith.subf %0, %5 : vector<16x32xf32>
    %7 = arith.mulf %6, %6 : vector<16x32xf32>
    %cst_2 = arith.constant dense<0.000000e+00> : vector<16xf32>
    %8 = vector.multi_reduction <add>, %7, %cst_2 [1] : vector<16x32xf32> to vector<16xf32>
    %9 = vector.shape_cast %8 : vector<16xf32> to vector<16x1xf32>
    %cst_3 = arith.constant 3.200000e+01 : f32
    %10 = vector.broadcast %cst_3 : f32 to vector<16x1xf32>
    %11 = arith.divf %9, %10 : vector<16x1xf32>
    %12 = vector.broadcast %4 : vector<16x1xf32> to vector<16x32xf32>
    %13 = arith.subf %0, %12 : vector<16x32xf32>
    %cst_4 = arith.constant 9.99999974E-6 : f32
    %14 = vector.broadcast %cst_4 : f32 to vector<16x1xf32>
    %15 = arith.addf %11, %14 : vector<16x1xf32>
    %16 = math.rsqrt %15 : vector<16x1xf32>
    %17 = vector.broadcast %16 : vector<16x1xf32> to vector<16x32xf32>
    %18 = arith.mulf %13, %17 : vector<16x32xf32>
    %c0_5 = arith.constant 0 : index
    %c0_6 = arith.constant 0 : index
    %19 = vector.load %arg2[%c0_5, %c0_6] : memref<1x32xf32, #tpu.memory_space<vmem>>, vector<1x32xf32>
    %20 = vector.broadcast %19 : vector<1x32xf32> to vector<16x32xf32>
    %21 = arith.mulf %18, %20 : vector<16x32xf32>
    %c0_7 = arith.constant 0 : index
    %c0_8 = arith.constant 0 : index
    %22 = vector.load %arg3[%c0_7, %c0_8] : memref<1x32xf32, #tpu.memory_space<vmem>>, vector<1x32xf32>
    %23 = vector.broadcast %22 : vector<1x32xf32> to vector<16x32xf32>
    %24 = arith.addf %21, %23 : vector<16x32xf32>
    %25 = arith.truncf %24 : vector<16x32xf32> to vector<16x32xbf16>
    %c0_9 = arith.constant 0 : index
    %c0_10 = arith.constant 0 : index
    %26 = vector.load %arg4[%c0_9, %c0_10] : memref<32x128xbf16, #tpu.memory_space<vmem>>, vector<32x128xbf16>
    %cst_11 = arith.constant dense<0.000000e+00> : vector<16x128xf32>
    %27 = tpu.matmul %25, %26, %cst_11 {dimension_numbers = #tpu.dot_dimension_numbers<[1], [0], [0], [1], [0, 0, 1, 1], [], []>} : vector<16x32xbf16>, vector<32x128xbf16>, vector<16x128xf32> -> vector<16x128xf32>
    %c0_12 = arith.constant 0 : index
    %c0_13 = arith.constant 0 : index
    %28 = vector.load %arg5[%c0_12, %c0_13] : memref<1x128xf32, #tpu.memory_space<vmem>>, vector<1x128xf32>
    %29 = vector.broadcast %28 : vector<1x128xf32> to vector<16x128xf32>
    %30 = arith.addf %27, %29 : vector<16x128xf32>
    %cst_14 = arith.constant 0.000000e+00 : f32
    %31 = vector.broadcast %cst_14 : f32 to vector<16x128xf32>
    %32 = arith.maximumf %30, %31 : vector<16x128xf32>
    %33 = arith.truncf %32 : vector<16x128xf32> to vector<16x128xbf16>
    %c0_15 = arith.constant 0 : index
    %c0_16 = arith.constant 0 : index
    %34 = vector.load %arg6[%c0_15, %c0_16] : memref<128x32xbf16, #tpu.memory_space<vmem>>, vector<128x32xbf16>
    %cst_17 = arith.constant dense<0.000000e+00> : vector<16x32xf32>
    %35 = tpu.matmul %33, %34, %cst_17 {dimension_numbers = #tpu.dot_dimension_numbers<[1], [0], [0], [1], [0, 0, 1, 1], [], []>} : vector<16x128xbf16>, vector<128x32xbf16>, vector<16x32xf32> -> vector<16x32xf32>
    %c0_18 = arith.constant 0 : index
    %c0_19 = arith.constant 0 : index
    %36 = vector.load %arg7[%c0_18, %c0_19] : memref<1x32xf32, #tpu.memory_space<vmem>>, vector<1x32xf32>
    %37 = vector.broadcast %36 : vector<1x32xf32> to vector<16x32xf32>
    %38 = arith.addf %35, %37 : vector<16x32xf32>
    %cst_20 = arith.constant 0.000000e+00 : f32
    %39 = vector.broadcast %cst_20 : f32 to vector<16x32xf32>
    %40 = arith.maximumf %38, %39 : vector<16x32xf32>
    %41 = arith.truncf %40 : vector<16x32xf32> to vector<16x32xbf16>
    %c0_21 = arith.constant 0 : index
    %c0_22 = arith.constant 0 : index
    %42 = vector.load %arg8[%c0_21, %c0_22] : memref<32x128xbf16, #tpu.memory_space<vmem>>, vector<32x128xbf16>
    %cst_23 = arith.constant dense<0.000000e+00> : vector<16x128xf32>
    %43 = tpu.matmul %41, %42, %cst_23 {dimension_numbers = #tpu.dot_dimension_numbers<[1], [0], [0], [1], [0, 0, 1, 1], [], []>} : vector<16x32xbf16>, vector<32x128xbf16>, vector<16x128xf32> -> vector<16x128xf32>
    %c0_24 = arith.constant 0 : index
    %c0_25 = arith.constant 0 : index
    %44 = vector.load %arg9[%c0_24, %c0_25] : memref<1x128xf32, #tpu.memory_space<vmem>>, vector<1x128xf32>
    %45 = vector.broadcast %44 : vector<1x128xf32> to vector<16x128xf32>
    %46 = arith.addf %43, %45 : vector<16x128xf32>
    %c0_26 = arith.constant 0 : index
    %c0_27 = arith.constant 0 : index
    %47 = vector.load %arg10[%c0_26, %c0_27] : memref<16x128xf32, #tpu.memory_space<vmem>>, vector<16x128xf32>
    tpu.vector_store %arg10[%c0_26, %c0_27], %46 {strides = array<i32>} : memref<16x128xf32, #tpu.memory_space<vmem>>, vector<16x128xf32>,
    return
  }
  func.func @transform_0(%arg0: i32) -> (i32, i32) {
    %c0_i32 = arith.constant 0 : i32
    %c0_i32_0 = arith.constant 0 : i32
    return %arg0, %c0_i32 : i32, i32
  }
  func.func @transform_1(%arg0: i32) -> (i32, i32) {
    %c0_i32 = arith.constant 0 : i32
    %c0_i32_0 = arith.constant 0 : i32
    %c0_i32_1 = arith.constant 0 : i32
    return %c0_i32, %c0_i32_0 : i32, i32
  }
  func.func @transform_2(%arg0: i32) -> (i32, i32) {
    %c0_i32 = arith.constant 0 : i32
    %c0_i32_0 = arith.constant 0 : i32
    %c0_i32_1 = arith.constant 0 : i32
    return %c0_i32, %c0_i32_0 : i32, i32
  }
  func.func @transform_3(%arg0: i32) -> (i32, i32) {
    %c0_i32 = arith.constant 0 : i32
    %c0_i32_0 = arith.constant 0 : i32
    %c0_i32_1 = arith.constant 0 : i32
    return %c0_i32, %c0_i32_0 : i32, i32
  }
  func.func @transform_4(%arg0: i32) -> (i32, i32) {
    %c0_i32 = arith.constant 0 : i32
    %c0_i32_0 = arith.constant 0 : i32
    %c0_i32_1 = arith.constant 0 : i32
    return %c0_i32, %c0_i32_0 : i32, i32
  }
  func.func @transform_5(%arg0: i32) -> (i32, i32) {
    %c0_i32 = arith.constant 0 : i32
    %c0_i32_0 = arith.constant 0 : i32
    %c0_i32_1 = arith.constant 0 : i32
    return %c0_i32, %c0_i32_0 : i32, i32
  }
  func.func @transform_6(%arg0: i32) -> (i32, i32) {
    %c0_i32 = arith.constant 0 : i32
    %c0_i32_0 = arith.constant 0 : i32
    %c0_i32_1 = arith.constant 0 : i32
    return %c0_i32, %c0_i32_0 : i32, i32
  }
  func.func @transform_7(%arg0: i32) -> (i32, i32) {
    %c0_i32 = arith.constant 0 : i32
    %c0_i32_0 = arith.constant 0 : i32
    %c0_i32_1 = arith.constant 0 : i32
    return %c0_i32, %c0_i32_0 : i32, i32
  }
  func.func @transform_8(%arg0: i32) -> (i32, i32) {
    %c0_i32 = arith.constant 0 : i32
    %c0_i32_0 = arith.constant 0 : i32
    %c0_i32_1 = arith.constant 0 : i32
    return %c0_i32, %c0_i32_0 : i32, i32
  }
  func.func @transform_9(%arg0: i32) -> (i32, i32) {
    %c0_i32 = arith.constant 0 : i32
    %c0_i32_0 = arith.constant 0 : i32
    return %arg0, %c0_i32 : i32, i32
  }
}

</mosaic_0001>

<bundles_post_ra>
// kernel: tpu_custom_call.1
= control target key start
LH: loop header
LB: loop body
LE: loop exit
PB: predicated region body
PF: predicated region fallthrough
CT: control target
= control target key end

     0   :  { %vm36_vm0 = vcmask 261120   ;;  %s506_s0 = inlined_call_operand.vmem [shape: f32[16,32], index: 0, kind: input, shape index: {}]   ;;  %s507_s1 = inlined_call_operand.vmem [shape: f32[1,32], index: 1, kind: input, shape index: {}]   ;;  %s508_s2 = inlined_call_operand.vmem [shape: f32[1,32], index: 2, kind: input, shape index: {}]   ;;  %s509_s3 = inlined_call_operand.vmem [shape: bf16[32,128], index: 3, kind: input, shape index: {}]   ;;  %s510_s4 = inlined_call_operand.vmem [shape: f32[1,128], index: 4, kind: input, shape index: {}]   ;;  %s511_s5 = inlined_call_operand.vmem [shape: bf16[128,32], index: 5, kind: input, shape index: {}]   ;;  %s512_s6 = inlined_call_operand.vmem [shape: f32[1,32], index: 6, kind: input, shape index: {}]   ;;  %s513_s7 = inlined_call_operand.vmem [shape: bf16[32,128], index: 7, kind: input, shape index: {}]   ;;  %s514_s8 = inlined_call_operand.vmem [shape: f32[1,128], index: 8, kind: input, shape index: {}]   ;;  %s515_s9 = inlined_call_operand.hbm [shape: f32[16,128], index: 9, kind: output, shape index: {}]  }
   0x1   :  { %v34_v0 = vld [vmem:[%s506_s0] sm:$0xff] }
   0x2   :  { %v37_v1 = vsel %vm36_vm0, %v34_v0, 0.0 }
   0x3   :  { %38 = vadd.xlane.f32.xlu0 %v37_v1 }
   0x4   :  { %14 = vsyncpa [#allocation3], 0  ;;  %v35_v2 = vld [vmem:[%s506_s0 + $0x8] sm:$0xff]  ;;  %v386_v4 = vmov 32.0   ;;  %v333_v23 = vld [vmem:[%s509_s3] sm:$0xff]  ;;  %s388_s21 = smov 128  }
   0x5   :  { %v40_v3 = vsel %vm36_vm0, %v35_v2, 0.0  ;;  %354 = vrcp.f32 %v386_v4  ;;  %v334_v21 = vld [vmem:[%s509_s3 + $0x8] sm:$0xff]  ;;  %v342_v26 = vld [vmem:[%s511_s5 + $0x38] sm:$0xff]  ;;  %v341_v29 = vld [vmem:[%s511_s5 + $0x30] sm:$0xff]  ;;  %s389_s22 = smov 8  }
   0x6   :  { %130 = vmatpush.bf16.msra.mxu0 %v334_v21  ;;  %209 = vmatpush.bf16.msra.mxu1 %v342_v26  ;;  %v340_v33 = vld [vmem:[%s511_s5 + $0x28] sm:$0xff]  ;;  %v339_v36 = vld [vmem:[%s511_s5 + $0x20] sm:$0xff]  ;;  %v338_v56 = vld [vmem:[%s511_s5 + $0x18] sm:$0xff] }
   0x7   :  { %v349_v46 = vld [vmem:[%s507_s1] ss:$0 sm:$0xff]  ;;  %v337_v57 = vld [vmem:[%s511_s5 + $0x10] sm:$0xff]  ;;  %v336_v58 = vld [vmem:[%s511_s5 + $0x8] sm:$0xff] }
   0x8   :  { %v350_v51 = vld [vmem:[%s508_s2] ss:$0 sm:$0xff]  ;;  %v344_v4 = vld [vmem:[%s513_s7 + $0x8] sm:$0xff] }
   0x9   :  { %v335_v59 = vld [vmem:[%s511_s5] sm:$0xff]  ;;  %255 = vmatpush.bf16.msra.mxu2 %v344_v4 }
   0xa   :  { %131 = vmatpush.bf16.msra.mxu0 %v333_v23  ;;  %210 = vmatpush.bf16.msra.mxu1 %v341_v29  ;;  %v351_v61 = vld [vmem:[%s510_s4] ss:$0 sm:$0xff] }
   0xb   :  { %41 = vadd.xlane.f32.xlu0 %v40_v3  ;;  %v355_v5 = vpop.eup %354 }
   0xc   :  { %v44_v6 = vmul.f32 32.0, %v355_v5  ;;  %vm48_vm1 = vweird.f32 %v355_v5 }
   0xe   :  { %v45_v7 = vsub.f32 1.0, %v44_v6  ;;  %211 = vmatpush.bf16.msra.mxu1 %v340_v33 }
  0x10   :  { %v46_v8 = vmul.f32 %v355_v5, %v45_v7  ;;  %v352_v7 = vld [vmem:[%s512_s6] ss:$0 sm:$0xff]  ;;  %s271_s6 = sshll.u32 %s515_s9, 4  ;;  %s272_s6 = int_to_ptr.hbm [resolvable:$true] %s271_s6 }
  0x12   :  { %v47_v9 = vadd.f32 %v355_v5, %v46_v8  ;;  %212 = vmatpush.bf16.msra.mxu1 %v339_v36 }
  0x14   :  { %v49_v10 = vsel %vm48_vm1, %v355_v5, %v47_v9  ;;  %v343_v5 = vld [vmem:[%s513_s7] sm:$0xff]  ;;  %s387_s7 = smov [#allocation2]  }
  0x15   :  { %256 = vmatpush.bf16.msra.mxu2 %v343_v5  ;;  %s269_s19 = sshll.u32 %s387_s7, 4  ;;  %s270_s19 = int_to_ptr.vmem [resolvable:$true] %s269_s19 }
  0x16   :  { %213 = vmatpush.bf16.msra.mxu1 %v338_v56 }
  0x1a   :  { %214 = vmatpush.bf16.msra.mxu1 %v337_v57 }
  0x1e   :  { %215 = vmatpush.bf16.msra.mxu1 %v336_v58 }
  0x22   :  { %216 = vmatpush.bf16.msra.mxu1 %v335_v59 }
  0x76   :  { %v39_v11 = vpop.xlane.xlu0 %38 }
  0x77   :  { %v50_v12 = vmul.f32 %v49_v10, %v39_v11 }
  0x79   :  { %v52_v13 = vsub.f32 %v34_v0, %v50_v12 }
  0x7b   :  { %v54_v14 = vmul.f32 %v52_v13, %v52_v13 }
  0x7d   :  { %v56_v15 = vsel %vm36_vm0, %v54_v14, 0.0  ;;  %v353_v14 = vld [vmem:[%s514_s8] ss:$0 sm:$0xff] }
  0x7e   :  { %57 = vadd.xlane.f32.xlu1 %v56_v15  ;;  %v42_v16 = vpop.xlane.xlu0 %41 }
  0x7f   :  { %v51_v17 = vmul.f32 %v49_v10, %v42_v16 }
  0x81   :  { %v53_v18 = vsub.f32 %v35_v2, %v51_v17 }
  0x83   :  { %v55_v19 = vmul.f32 %v53_v18, %v53_v18 }
  0x85   :  { %v59_v20 = vsel %vm36_vm0, %v55_v19, 0.0 }
  0x86   :  { %60 = vadd.xlane.f32.xlu1 %v59_v20 }
  0xf1   :  { %v58_v22 = vpop.xlane.xlu1 %57 }
  0xf2   :  { %v62_v24 = vmul.f32 %v58_v22, %v49_v10 }
  0xf4   :  { %v64_v25 = vadd.f32 1e-05, %v62_v24 }
  0xf6   :  { %356 = vrsqrt.f32 %v64_v25  ;;  %vm72_vm3 = vweird.f32 %v64_v25 }
  0xf9   :  { %v61_v27 = vpop.xlane.xlu1 %60 }
  0xfa   :  { %v63_v28 = vmul.f32 %v61_v27, %v49_v10 }
  0xfc   :  { %v357_v30 = vpop.eup %356  ;;  %v65_v31 = vadd.f32 1e-05, %v63_v28 }
  0xfd   :  { %v67_v32 = vmul.f32 %v357_v30, %v64_v25  ;;  %vm73_vm2 = vweird.f32 %v357_v30 }
  0xfe   :  { %358 = vrsqrt.f32 %v65_v31  ;;  %vm74_vm4 = vmor %vm72_vm3, %vm73_vm2  ;;  %vm82_vm6 = vweird.f32 %v65_v31 }
  0xff   :  { %v68_v34 = vmul.f32 %v357_v30, %v67_v32 }
 0x101   :  { %v69_v35 = vmul.f32 0.5, %v68_v34 }
 0x103   :  { %v70_v37 = vsub.f32 1.5, %v69_v35 }
 0x104   :  { %v359_v38 = vpop.eup %358 }
 0x105   :  { %v71_v39 = vmul.f32 %v357_v30, %v70_v37  ;;  %v77_v40 = vmul.f32 %v359_v38, %v65_v31  ;;  %vm83_vm5 = vweird.f32 %v359_v38 }
 0x106   :  { %vm84_vm7 = vmor %vm82_vm6, %vm83_vm5 }
 0x107   :  { %v78_v41 = vmul.f32 %v359_v38, %v77_v40  ;;  %v75_v42 = vsel %vm74_vm4, %v357_v30, %v71_v39 }
 0x108   :  { %v86_v45 = vmul.f32 %v75_v42, %v52_v13 }
 0x109   :  { %v79_v43 = vmul.f32 0.5, %v78_v41 }
 0x10a   :  { %v92_v50 = vmul.f32 %v349_v46, %v86_v45 }
 0x10b   :  { %v80_v44 = vsub.f32 1.5, %v79_v43 }
 0x10c   :  { %v98_v53 = vadd.f32 %v350_v51, %v92_v50 }
 0x10d   :  { %v81_v47 = vmul.f32 %v359_v38, %v80_v44 }
 0x10f   :  { %v85_v48 = vsel %vm84_vm7, %v359_v38, %v81_v47 }
 0x110   :  { %v87_v49 = vmul.f32 %v85_v48, %v53_v18 }
 0x112   :  { %v93_v52 = vmul.f32 %v349_v46, %v87_v49 }
 0x114   :  { %v99_v54 = vadd.f32 %v350_v51, %v93_v52 }
 0x116   :  { %v100_v55 = vpack.c.bf16 %v99_v54, %v98_v53 }
 0x118   :  { %291 = vmatmul.msk.bf16.vlgmr.msra.gmra.mxu0 %vm36_vm0, %v100_v55 }
 0x195   :  { %v133_v60 = vpop.f32.mrf.mxu0 }
 0x196   :  { %v134_v62 = vadd.f32 %v351_v61, %v133_v60 }
 0x198   :  { %v138_v1 = vmax.f32 %v134_v62, 0.0 }
 0x19d   :  { %v135_v63 = vpop.f32.mrf.mxu0 }
 0x19e   :  { %v136_v0 = vadd.f32 %v351_v61, %v135_v63 }
 0x1a0   :  { %v139_v2 = vmax.f32 %v136_v0, 0.0 }
 0x1a2   :  { %v140_v3 = vpack.c.bf16 %v139_v2, %v138_v1 }
 0x1a4   :  { %217 = vmatmul.bf16.vlgmr.msra.gmra.mxu1 %v140_v3 }
 0x221   :  { %v218_v6 = vpop.f32.mrf.mxu1 }
 0x222   :  { %v219_v8 = vadd.f32 %v352_v7, %v218_v6 }
 0x224   :  { %v223_v11 = vmax.f32 %v219_v8, 0.0 }
 0x229   :  { %v220_v9 = vpop.f32.mrf.mxu1 }
 0x22a   :  { %v221_v10 = vadd.f32 %v352_v7, %v220_v9 }
 0x22c   :  { %v224_v12 = vmax.f32 %v221_v10, 0.0 }
 0x22e   :  { %v225_v13 = vpack.c.bf16 %v224_v12, %v223_v11 }
 0x230   :  { %332 = vmatmul.msk.bf16.vlgmr.msra.gmra.mxu2 %vm36_vm0, %v225_v13 }
 0x2b3   :  { %v258_v15 = vpop.f32.mrf.mxu2 }
 0x2b4   :  { %v259_v16 = vadd.f32 %v353_v14, %v258_v15 }
 0x2b6   :  { %263 = vst [vmem:[#allocation2] sm:$0xff] %v259_v16 }
 0x2bb   :  { %v260_v17 = vpop.f32.mrf.mxu2 }
 0x2bc   :  { %v261_v18 = vadd.f32 %v353_v14, %v260_v17 }
 0x2be   :  { %264 = vst [vmem:[#allocation2 + $0x8] sm:$0xff] %v261_v18 }
 0x2bf   :  { %277 = dma.vmem_to_hbm [thread:$0]  %s270_s19, 256, %s272_s6, [#allocation3], %s388_s21, %s388_s21, %s389_s22  }
 0x2c0   :  { %384 = dma.done.wait [#allocation3], 256  }
 0x2c1   :  { %385 = vsyncadd [#allocation3], 4294967040 }
 0x2c2   :  { %282 = vsyncpa [#allocation3], 1 }

</bundles_post_ra>
